<compile_context>
chip_gen: v5e
topology: v5e:2x2
jax: 0.10.0
libtpu: 0.0.40
codegen_flags: <defaults>
</compile_context>

<pallas_src>
import jax
import jax.numpy as jnp
from jax.experimental import pallas as pl
from jax.experimental.pallas import tpu as pltpu


# ------------------------------ helpers ------------------------------------ #
def _round_up(x, m):
    return (x + m - 1) // m * m


def _pick_tile(target, full, align=128):
    """Largest tile <= target (multiple of `align`) that divides the
    align-rounded extent, to minimize zero-padding waste."""
    full_a = _round_up(max(full, 1), align)
    cap = min(_round_up(target, align), full_a)
    t = cap - (cap % align)
    while t >= align:
        if full_a % t == 0:
            return t
        t -= align
    return cap


# generation -> (tm, tn, tk, full_k_cap, vmem_limit_bytes)
_PLAN_TABLE = {
    "v5": (512, 512, 1024, 2048, 64 * 1024 * 1024),
    "v6": (1024, 2048, 1024, 2048, 96 * 1024 * 1024),
    "v7": (1024, 1024, 512, 1024, 48 * 1024 * 1024),
    "default": (512, 512, 512, 1024, 64 * 1024 * 1024),
}


def _tpu_generation():
    try:
        kind = jax.devices()[0].device_kind.lower()
    except Exception:
        return "default"
    if "v7" in kind or "7x" in kind:
        return "v7"
    if "v6" in kind:
        return "v6"
    if "v5" in kind and ("lite" in kind or "v5e" in kind):
        return "v5"
    return "default"


def _vmem_cap_bytes():
    try:
        return int(pltpu.get_tpu_info().vmem_capacity_bytes)
    except Exception:
        return None


# ----------------------------- Pallas kernels ------------------------------ #
# 2-D grid: full-K contraction in one step -> no accumulator scratch, bias
# fused into the single down-cast store.
def _mm_bias_2d_kernel(x_ref, wt_ref, b_ref, o_ref):
    acc = jnp.dot(x_ref[...], wt_ref[...], preferred_element_type=jnp.float32)
    o_ref[...] = (acc + b_ref[...].astype(jnp.float32)).astype(o_ref.dtype)


def _mm_2d_kernel(x_ref, wt_ref, o_ref):
    o_ref[...] = jnp.dot(
        x_ref[...], wt_ref[...], preferred_element_type=jnp.float32
    ).astype(o_ref.dtype)


# 3-D grid: K innermost ("arbitrary"), resident f32 VMEM accumulator; bias is
# added exactly once in the k==last finalize step.
def _mm_bias_3d_kernel(x_ref, wt_ref, b_ref, o_ref, acc_ref):
    k = pl.program_id(2)

    @pl.when(k == 0)
    def _init():
        acc_ref[...] = jnp.zeros_like(acc_ref)

    acc_ref[...] += jnp.dot(
        x_ref[...], wt_ref[...], preferred_element_type=jnp.float32
    )

    @pl.when(k == pl.num_programs(2) - 1)
    def _finalize():
        o_ref[...] = (acc_ref[...] + b_ref[...].astype(jnp.float32)).astype(
            o_ref.dtype
        )


def _mm_3d_kernel(x_ref, wt_ref, o_ref, acc_ref):
    k = pl.program_id(2)

    @pl.when(k == 0)
    def _init():
        acc_ref[...] = jnp.zeros_like(acc_ref)

    acc_ref[...] += jnp.dot(
        x_ref[...], wt_ref[...], preferred_element_type=jnp.float32
    )

    @pl.when(k == pl.num_programs(2) - 1)
    def _finalize():
        o_ref[...] = acc_ref[...].astype(o_ref.dtype)


# ------------------------------ matmul wrapper ------------------------------ #
def fused_qkv_matmul(x2d, wt_p, b2d, *, n_out, out_dtype, tm_target, tn, tk,
                     vmem_limit):
    """x2d: (M, K) activations; wt_p: (Kp, Np) pre-transposed, pre-padded
    weight; b2d: (1, Np) pre-padded bias or None  ->  (M, n_out)."""
    M, K = x2d.shape
    Kp, Np = wt_p.shape
    assert Kp >= K and Kp % tk == 0 and Np % tn == 0

    # M tile: bf16 sublane pack is 16; shrink for small M.
    tm = _pick_tile(tm_target, M, align=16)
    Mp = _round_up(M, tm)

    out_itemsize = jnp.dtype(out_dtype).itemsize
    full_k = tk == Kp

    def _footprint(tm_):
        f = 2 * tm_ * tk * x2d.dtype.itemsize          # x, double-buffered
        f += 2 * tk * tn * wt_p.dtype.itemsize          # w, double-buffered
        f += 2 * tm_ * tn * out_itemsize                 # out, double-buffered
        if not full_k:
            f += tm_ * tn * 4                            # resident f32 acc
        if b2d is not None:
            f += 2 * tn * 4
        return f

    while _footprint(tm) > vmem_limit - (4 << 20) and tm > 16:
        tm = max(16, _round_up(tm // 2, 16))
        Mp = _round_up(M, tm)

    # Per-call activation padding only (weight/bias were padded at init).
    if (Mp, Kp) != (M, K):
        x2d = jnp.pad(x2d, ((0, Mp - M), (0, Kp - K)))

    if full_k:
        grid = (Mp // tm, Np // tn)
        in_specs = [
            pl.BlockSpec((tm, tk), lambda i, j: (i, 0)),
            pl.BlockSpec((tk, tn), lambda i, j: (0, j)),
        ]
        out_spec = pl.BlockSpec((tm, tn), lambda i, j: (i, j))
        scratch = []
        dims = ("parallel", "parallel")
        kernel = _mm_2d_kernel
        if b2d is not None:
            in_specs.append(pl.BlockSpec((1, tn), lambda i, j: (0, j)))
            kernel = _mm_bias_2d_kernel
    else:
        grid = (Mp // tm, Np // tn, Kp // tk)
        in_specs = [
            pl.BlockSpec((tm, tk), lambda i, j, k: (i, k)),
            pl.BlockSpec((tk, tn), lambda i, j, k: (k, j)),
        ]
        out_spec = pl.BlockSpec((tm, tn), lambda i, j, k: (i, j))
        scratch = [pltpu.VMEM((tm, tn), jnp.float32)]
        dims = ("parallel", "parallel", "arbitrary")
        kernel = _mm_3d_kernel
        if b2d is not None:
            in_specs.append(pl.BlockSpec((1, tn), lambda i, j, k: (0, j)))
            kernel = _mm_bias_3d_kernel

    operands = (x2d, wt_p) if b2d is None else (x2d, wt_p, b2d)

    # Actual streamed traffic: X re-read per N tile, W re-read per M tile,
    # output written once.
    n_tiles_n = Np // tn
    n_tiles_m = Mp // tm
    bytes_accessed = (
        Mp * Kp * x2d.dtype.itemsize * n_tiles_n
        + Kp * Np * wt_p.dtype.itemsize * n_tiles_m
        + (Np * 4 * n_tiles_m if b2d is not None else 0)
        + Mp * Np * out_itemsize
    )
    cost = pl.CostEstimate(
        flops=2 * Mp * Np * Kp, transcendentals=0, bytes_accessed=bytes_accessed
    )

    out = pl.pallas_call(
        kernel,
        out_shape=jax.ShapeDtypeStruct((Mp, Np), out_dtype),
        grid_spec=pltpu.PrefetchScalarGridSpec(
            num_scalar_prefetch=0,
            grid=grid,
            in_specs=in_specs,
            out_specs=out_spec,
            scratch_shapes=scratch,
        ),
        compiler_params=pltpu.CompilerParams(
            dimension_semantics=dims,
            vmem_limit_bytes=vmem_limit,
        ),
        cost_estimate=cost,
    )(*operands)

    if (Mp, Np) != (M, n_out):
        out = out[:M, :n_out]
    return out


# ----------------------------- Module wrapper ------------------------------ #
class FusedQKVPallas:
    """JAX/Pallas re-implementation of fms FusedQKV forward pass."""

    def __init__(self, emb_dim, nheads, kvheads, emb_kq_per_head,
                 emb_v_per_head, use_bias, key, param_dtype=jnp.bfloat16,
                 out_dtype=None):
        self.emb_dim = emb_dim
        self.nheads = nheads
        self.kvheads = kvheads
        self.emb_kq_per_head = emb_kq_per_head
        self.emb_v_per_head = emb_v_per_head
        self.use_bias = use_bias
        self.param_dtype = param_dtype
        # NOTE: activations are cast to param_dtype (bf16 by default) for the
        # MXU; accumulation stays f32. Pass param_dtype=jnp.float32 for full
        # f32 numerics. out_dtype=None keeps the caller's dtype; bf16 halves
        # output HBM traffic if the downstream attention accepts it.
        self.out_dtype = out_dtype

        self.splits = [
            nheads * emb_kq_per_head,
            kvheads * emb_kq_per_head,
            kvheads * emb_v_per_head,
        ]
        self.out_dim = sum(self.splits)

        # --- per-generation tile plan (depends only on weight shape) -------
        gen = _tpu_generation()
        tm_t, tn_t, tk_t, full_k_cap, vmem_limit = _PLAN_TABLE[gen]
        cap = _vmem_cap_bytes()
        if cap is not None:
            vmem_limit = min(vmem_limit, cap)
        self.vmem_limit = vmem_limit
        self.tm_target = tm_t

        self.tn = _pick_tile(tn_t, self.out_dim)
        if gen == "v7":
            # keep >=2 output tiles along N so both TensorCores get work even
            # for decode-shaped (M <= tm) calls.
            while (_round_up(self.out_dim, 128) // self.tn < 2
                   and self.tn >= 256 and (self.tn // 2) % 128 == 0):
                self.tn //= 2

        Kp128 = _round_up(emb_dim, 128)
        if Kp128 <= full_k_cap:
            self.tk = Kp128          # full-K single pass -> 2-D grid, no acc
        else:
            self.tk = _pick_tile(tk_t, emb_dim)

        self.Np = _round_up(self.out_dim, self.tn)
        self.Kp = _round_up(emb_dim, self.tk)

        # --- parameters: reset_parameters() semantics -----------------------
        # torch Linear layout [out_features, in_features], trunc_normal std=0.02
        w = 0.02 * jax.random.truncated_normal(
            key, -2.0, 2.0, (self.out_dim, emb_dim), dtype=jnp.float32
        )
        wt = w.T.astype(param_dtype)  # pre-transposed (K, N)
        # One-time padding to tile multiples (moved out of the per-call path).
        if (self.Kp, self.Np) != (emb_dim, self.out_dim):
            wt = jnp.pad(wt, ((0, self.Kp - emb_dim), (0, self.Np - self.out_dim)))
        self.weight_t = wt

        if use_bias:
            b2d = jnp.zeros((1, self.out_dim), dtype=jnp.float32)  # zeroed bias
            if self.Np != self.out_dim:
                b2d = jnp.pad(b2d, ((0, 0), (0, self.Np - self.out_dim)))
            self.bias2d = b2d
        else:
            self.bias2d = None   # no-bias kernel variant, no dummy zero-add

    def __call__(self, q, k=None, v=None):
        if not (k is None and v is None) and not (k is q and v is q):
            raise ValueError("q, k, and v must be the same or k and v must be None")
        qkv = q  # [batch, seq, emb_dim]
        B, S, E = qkv.shape
        assert E == self.emb_dim
        out_dtype = self.out_dtype if self.out_dtype is not None else qkv.dtype

        x2d = qkv.reshape(B * S, E).astype(self.param_dtype)
        out2d = fused_qkv_matmul(
            x2d, self.weight_t, self.bias2d,
            n_out=self.out_dim, out_dtype=out_dtype,
            tm_target=self.tm_target, tn=self.tn, tk=self.tk,
            vmem_limit=self.vmem_limit,
        )
        out = out2d.reshape(B, S, self.out_dim)
        s0, s1, _ = self.splits
        # TODO(synk): when all three split widths are multiples of 128 lanes
        # (production head configs; not this toy demo), emit q/k/v as three
        # separate lane-dense kernel outputs instead of slicing here, saving
        # an extra read+write of the fused output.
        queries = out[..., :s0]
        keys = out[..., s0:s0 + s1]
        values = out[..., s0 + s1:]
        return queries, keys, values


# --------------------------------- Main ------------------------------------ #
if __name__ == "__main__":
    key = jax.random.PRNGKey(0)
    k_w, k_x = jax.random.split(key)

    # Small but representative config.
    emb_dim = 32
    nheads = 4
    kvheads = 2
    emb_kq_per_head = 8
    emb_v_per_head = 8
    batch, seq = 2, 8

    module = FusedQKVPallas(
        emb_dim, nheads, kvheads, emb_kq_per_head, emb_v_per_head,
        use_bias=True, key=k_w,
    )

    x = jax.random.normal(k_x, (batch, seq, emb_dim), dtype=jnp.float32)

    q_out, k_out, v_out = module(x)  # k=v=None path (self-attention)
    jax.block_until_ready((q_out, k_out, v_out))

    # Reference check in plain JAX against the same bf16-rounded operands.
    x_bf = x.astype(module.param_dtype).astype(jnp.float32)
    w_f = module.weight_t[:emb_dim, :module.out_dim].astype(jnp.float32)
    ref = x_bf.reshape(-1, emb_dim) @ w_f
    if module.bias2d is not None:
        ref = ref + module.bias2d[:, :module.out_dim]
    ref = ref.reshape(batch, seq, -1)

    s0, s1, _ = module.splits
    assert q_out.shape == (batch, seq, nheads * emb_kq_per_head)
    assert k_out.shape == (batch, seq, kvheads * emb_kq_per_head)
    assert v_out.shape == (batch, seq, kvheads * emb_v_per_head)
    assert jnp.allclose(q_out.astype(jnp.float32), ref[..., :s0], atol=2e-2, rtol=2e-2)
    assert jnp.allclose(k_out.astype(jnp.float32), ref[..., s0:s0 + s1], atol=2e-2, rtol=2e-2)
    assert jnp.allclose(v_out.astype(jnp.float32), ref[..., s0 + s1:], atol=2e-2, rtol=2e-2)

    print("KERNEL_OK")
</pallas_src>

<mosaic_0001>
module attributes {stable_mosaic.version = 11 : i64} {
  func.func @_mm_bias_2d_kernel(%arg0: i32, %arg1: i32, %arg2: memref<16x128xbf16, #tpu.memory_space<vmem>>, %arg3: memref<128x128xbf16, #tpu.memory_space<vmem>>, %arg4: memref<1x128xf32, #tpu.memory_space<vmem>>, %arg5: memref<16x128xf32, #tpu.memory_space<vmem>>) attributes {dimension_semantics = [#tpu.dimension_semantics<parallel>, #tpu.dimension_semantics<parallel>], iteration_bounds = array<i64: 1, 1>, scalar_prefetch = 0 : i64, scratch_operands = 0 : i64, tpu.core_type = #tpu.core_type<tc>, window_params = [{transform_indices = @transform_0, window_bounds = array<i64: 16, 128>}, {transform_indices = @transform_1, window_bounds = array<i64: 128, 128>}, {transform_indices = @transform_2, window_bounds = array<i64: 1, 128>}, {transform_indices = @transform_3, window_bounds = array<i64: 16, 128>}]} {
    %c0 = arith.constant 0 : index
    %c0_0 = arith.constant 0 : index
    %0 = vector.load %arg2[%c0, %c0_0] : memref<16x128xbf16, #tpu.memory_space<vmem>>, vector<16x128xbf16>
    %c0_1 = arith.constant 0 : index
    %c0_2 = arith.constant 0 : index
    %1 = vector.load %arg3[%c0_1, %c0_2] : memref<128x128xbf16, #tpu.memory_space<vmem>>, vector<128x128xbf16>
    %cst = arith.constant dense<0.000000e+00> : vector<16x128xf32>
    %2 = tpu.matmul %0, %1, %cst {dimension_numbers = #tpu.dot_dimension_numbers<[1], [0], [0], [1], [0, 0, 1, 1], [], []>} : vector<16x128xbf16>, vector<128x128xbf16>, vector<16x128xf32> -> vector<16x128xf32>
    %c0_3 = arith.constant 0 : index
    %c0_4 = arith.constant 0 : index
    %3 = vector.load %arg4[%c0_3, %c0_4] : memref<1x128xf32, #tpu.memory_space<vmem>>, vector<1x128xf32>
    %4 = vector.broadcast %3 : vector<1x128xf32> to vector<16x128xf32>
    %5 = arith.addf %2, %4 : vector<16x128xf32>
    %c0_5 = arith.constant 0 : index
    %c0_6 = arith.constant 0 : index
    %6 = vector.load %arg5[%c0_5, %c0_6] : memref<16x128xf32, #tpu.memory_space<vmem>>, vector<16x128xf32>
    tpu.vector_store %arg5[%c0_5, %c0_6], %5 {strides = array<i32>} : memref<16x128xf32, #tpu.memory_space<vmem>>, vector<16x128xf32>,
    return
  }
  func.func @transform_0(%arg0: i32, %arg1: i32) -> (i32, i32) {
    %c0_i32 = arith.constant 0 : i32
    %c0_i32_0 = arith.constant 0 : i32
    return %arg0, %c0_i32 : i32, i32
  }
  func.func @transform_1(%arg0: i32, %arg1: i32) -> (i32, i32) {
    %c0_i32 = arith.constant 0 : i32
    %c0_i32_0 = arith.constant 0 : i32
    return %c0_i32, %arg1 : i32, i32
  }
  func.func @transform_2(%arg0: i32, %arg1: i32) -> (i32, i32) {
    %c0_i32 = arith.constant 0 : i32
    %c0_i32_0 = arith.constant 0 : i32
    return %c0_i32, %arg1 : i32, i32
  }
  func.func @transform_3(%arg0: i32, %arg1: i32) -> (i32, i32) {
    %c0_i32 = arith.constant 0 : i32
    return %arg0, %arg1 : i32, i32
  }
}

</mosaic_0001>

<bundles_post_ra>
// kernel: tpu_custom_call.1
= control target key start
LH: loop header
LB: loop body
LE: loop exit
PB: predicated region body
PF: predicated region fallthrough
CT: control target
= control target key end

     0   :  { %8 = vsyncpa [#allocation3], 0  ;;  %s329_s0 = inlined_call_operand.hbm [shape: bf16[16,128], index: 0, kind: input, shape index: {}]   ;;  %s330_s1 = inlined_call_operand.hbm [shape: bf16[128,128], index: 1, kind: input, shape index: {}]   ;;  %s331_s2 = inlined_call_operand.vmem [shape: f32[1,128], index: 2, kind: input, shape index: {}]   ;;  %s332_s3 = inlined_call_operand.hbm [shape: f32[16,128], index: 3, kind: output, shape index: {}]  }
   0x1   :  { %9 = vsyncpa [#allocation6], 0 }
   0x2   :  { %10 = vsyncpa [#allocation4], 0  ;;  %s15_s14 = sshll.u32 %s329_s0, 4  ;;  %s290_s15 = smov [#allocation2]   ;;  %s16_s14 = int_to_ptr.hbm [resolvable:$true] %s15_s14 }
   0x3   :  { %s17_s16 = sshll.u32 %s290_s15, 4  ;;  %s28_s19 = sshll.u32 %s330_s1, 4  ;;  %s18_s16 = int_to_ptr.vmem [resolvable:$true] %s17_s16  ;;  %s29_s19 = int_to_ptr.hbm [resolvable:$true] %s28_s19 }
   0x4   :  { %s291_s20 = smov 64   ;;  %s292_s21 = smov 4  }
   0x5   :  { %23 = dma.hbm_to_vmem [thread:$0]  %s16_s14, 128, %s18_s16, [#allocation3], %s291_s20, %s291_s20, %s292_s21  }
   0x6   :  { %s293_s22 = smov [#allocation5]  }
   0x7   :  { %s30_s23 = sshll.u32 %s293_s22, 4  ;;  %s31_s23 = int_to_ptr.vmem [resolvable:$true] %s30_s23 }
   0x8   :  { %36 = dma.hbm_to_vmem [thread:$0]  %s29_s19, 1024, %s31_s23, [#allocation6], %s291_s20, %s291_s20, %s292_s21  }
   0x9   :  { %284 = dma.done.wait [#allocation3], 128  }
   0xa   :  { %285 = vsyncadd [#allocation3], 4294967168 }
   0xb   :  { %286 = dma.done.wait [#allocation6], 1024  }
   0xc   :  { %287 = vsyncadd [#allocation6], 4294966272  ;;  %v203_v0 = vld [vmem:[#allocation5 + $0x38] sm:$0xff]  ;;  %v202_v1 = vld [vmem:[#allocation5 + $0x30] sm:$0xff]  ;;  %s294_s24 = smov [#allocation7]   ;;  %s145_s28 = sshll.u32 %s332_s3, 4  ;;  %s146_s28 = int_to_ptr.hbm [resolvable:$true] %s145_s28 }
   0xd   :  { %123 = vmatpush.bf16.msra.mxu0 %v203_v0  ;;  %v201_v2 = vld [vmem:[#allocation5 + $0x28] sm:$0xff]  ;;  %v200_v3 = vld [vmem:[#allocation5 + $0x20] sm:$0xff]  ;;  %v199_v4 = vld [vmem:[#allocation5 + $0x18] sm:$0xff]  ;;  %s143_s25 = sshll.u32 %s294_s24, 4  ;;  %s295_s29 = smov 128   ;;  %s144_s25 = int_to_ptr.vmem [resolvable:$true] %s143_s25 }
   0xe   :  { %v198_v5 = vld [vmem:[#allocation5 + $0x10] sm:$0xff]  ;;  %v197_v6 = vld [vmem:[#allocation5 + $0x8] sm:$0xff]  ;;  %v196_v7 = vld [vmem:[#allocation5] sm:$0xff]  ;;  %s296_s30 = smov 8  }
   0xf   :  { %v195_v8 = vld [vmem:[#allocation2] sm:$0xff] }
  0x10   :  { %v211_v9 = vld [vmem:[%s331_s2] ss:$0 sm:$0xff] }
  0x11   :  { %124 = vmatpush.bf16.msra.mxu0 %v202_v1 }
  0x15   :  { %125 = vmatpush.bf16.msra.mxu0 %v201_v2 }
  0x19   :  { %126 = vmatpush.bf16.msra.mxu0 %v200_v3 }
  0x1d   :  { %127 = vmatpush.bf16.msra.mxu0 %v199_v4 }
  0x21   :  { %128 = vmatpush.bf16.msra.mxu0 %v198_v5 }
  0x25   :  { %129 = vmatpush.bf16.msra.mxu0 %v197_v6 }
  0x29   :  { %130 = vmatpush.bf16.msra.mxu0 %v196_v7 }
  0x2c   :  { %131 = vmatmul.bf16.vlgmr.msra.gmra.mxu0 %v195_v8 }
  0xa9   :  { %v132_v10 = vpop.f32.mrf.mxu0 }
  0xaa   :  { %v133_v11 = vadd.f32 %v211_v9, %v132_v10 }
  0xac   :  { %137 = vst [vmem:[#allocation7] sm:$0xff] %v133_v11 }
  0xb1   :  { %v134_v12 = vpop.f32.mrf.mxu0 }
  0xb2   :  { %v135_v13 = vadd.f32 %v211_v9, %v134_v12 }
  0xb4   :  { %138 = vst [vmem:[#allocation7 + $0x8] sm:$0xff] %v135_v13 }
  0xb5   :  { %151 = dma.vmem_to_hbm [thread:$0]  %s144_s25, 256, %s146_s28, [#allocation4], %s295_s29, %s295_s29, %s296_s30  }
  0xb6   :  { %288 = dma.done.wait [#allocation4], 256  }
  0xb7   :  { %289 = vsyncadd [#allocation4], 4294967040 }
  0xb8   :  { %156 = vsyncpa [#allocation3], 1 }
  0xb9   :  { %157 = vsyncpa [#allocation6], 1 }
  0xba   :  { %158 = vsyncpa [#allocation4], 1 }

</bundles_post_ra>
